<compile_context>
chip_gen: v6e
topology: v6e:2x2x1
jax: 0.10.0
libtpu: 0.0.40
codegen_flags: <defaults>
</compile_context>

<pallas_src>
import functools

import jax
import jax.numpy as jnp
from jax.experimental import pallas as pl
from jax.experimental.pallas import tpu as pltpu


# -----------------------------------------------------------------------------
# Pallas kernels
# -----------------------------------------------------------------------------
def _conv1d_kernel(*refs, K, stride, B, T_out, act, has_res):
    """Fused Conv1d: in-register im2col (K tap GEMMs) + bias + residual + activation.

    x_ref   : (stride*B, T_ph, C_in)  phase-major padded input; row p*B+b is phase p of
              batch b (phase p holds padded time steps p, p+stride, ...).
    w_ref   : (K, C_in, C_out)
    b_ref   : (1, C_out)
    res_ref : (B*T_out, C_out)  optional residual (time-major within batch)
    o_ref   : (B*T_out, C_out)
    """
    if has_res:
        x_ref, w_ref, b_ref, res_ref, o_ref = refs
    else:
        x_ref, w_ref, b_ref, o_ref = refs
        res_ref = None

    C_out = o_ref.shape[-1]
    bias = b_ref[...]
    for b in range(B):                       # static unroll over (small) batch
        acc = jnp.zeros((T_out, C_out), jnp.float32) + bias
        for k in range(K):                   # tap accumulation: no HBM im2col
            p, o = k % stride, k // stride
            xk = x_ref[p * B + b, pl.ds(o, T_out), :]          # contiguous (T_out, C_in)
            acc = acc + jnp.dot(xk, w_ref[k], preferred_element_type=jnp.float32)
        if res_ref is not None:
            acc = acc + res_ref[pl.ds(b * T_out, T_out), :]
        if act == "silu":
            acc = acc * jax.nn.sigmoid(acc)
        elif act == "tanh":
            acc = jnp.tanh(acc)
        # TODO(synk): with C_out <= 32 this is still a masked sub-vreg store; packing rows
        # into the 128-lane axis would need a layout change downstream.
        o_ref[pl.ds(b * T_out, T_out), :] = acc.astype(o_ref.dtype)


def _gru_kernel(x_ref, wih_ref, bfold_ref, whh_ref, bhn_ref, o_ref, h_scr, gi_scr,
                *, Tc, B, C, fuse_tanh, unroll):
    """Fused GRU over one time chunk (input projection + recurrence + fused final tanh).

    x_ref     : (Tc*B, C)    time-major input rows for this chunk
    wih_ref   : (C, 3C)      input-to-hidden weights (gate order r, z, n)
    bfold_ref : (1, 3C)      b_ir+b_hr | b_iz+b_hz | b_in
    whh_ref   : (C, 3C)      hidden-to-hidden weights
    bhn_ref   : (1, C)       b_hn (applied inside r * (...))
    o_ref     : (Tc*B, C)
    h_scr     : (B, C) f32   hidden state carried across chunks (grid axis 'arbitrary')
    gi_scr    : (Tc*B, 3C)   per-chunk input projection (never round-trips HBM)
    """
    @pl.when(pl.program_id(0) == 0)
    def _():
        h_scr[...] = jnp.zeros_like(h_scr)

    # Hoisted input projection for the whole chunk: one deep MXU GEMM into VMEM scratch.
    gi_scr[...] = (jnp.dot(x_ref[...], wih_ref[...], preferred_element_type=jnp.float32)
                   + bfold_ref[...])

    whh = whh_ref[...]
    bhn = bhn_ref[...]

    def step(t, h):
        gh = jnp.dot(h, whh, preferred_element_type=jnp.float32)    # one (B, 3C) push
        gi = gi_scr[pl.ds(t * B, B), :]                             # (B, 3C)
        r = jax.nn.sigmoid(gi[:, :C] + gh[:, :C])
        z = jax.nn.sigmoid(gi[:, C:2 * C] + gh[:, C:2 * C])
        n = jnp.tanh(gi[:, 2 * C:] + r * (gh[:, 2 * C:] + bhn))
        h_new = (1.0 - z) * n + z * h
        out = jnp.tanh(h_new) if fuse_tanh else h_new
        # TODO(synk): (B, C) = (2, 32) stores are masked sub-vreg writes; a lane-dense
        # staging layout would need packing multiple timesteps along lanes.
        o_ref[pl.ds(t * B, B), :] = out.astype(o_ref.dtype)
        return h_new

    # Modest unroll lets the scheduler overlap gi loads / output stores with the serial
    # h @ W_hh dependency chain.
    h_final = jax.lax.fori_loop(0, Tc, step, h_scr[...], unroll=unroll)
    h_scr[...] = h_final


# -----------------------------------------------------------------------------
# Pallas wrappers
# -----------------------------------------------------------------------------
def conv1d_block(x_btc, w, b, *, stride, pad, act, residual=None):
    """Conv1d(+bias)(+residual)(+activation) with the im2col fused into the kernel.

    x_btc: (B, T, C_in) channel-last; w: (K, C_in, C_out); b: (1, C_out).
    Returns (B, T_out, C_out).
    """
    B, T, C_in = x_btc.shape
    K, _, C_out = w.shape
    S = stride
    T_pad = T + 2 * pad
    T_out = (T_pad - K) // S + 1

    # Phase-split the padded input so the kernel only needs contiguous per-tap slices
    # (tap k of output t reads phase k%S at offset k//S + t).  One cheap ~1x-byte pass,
    # instead of a K-times-widened im2col round trip through HBM.
    T_ph = -(-T_pad // S)
    extra = T_ph * S - T_pad
    x_pad = jnp.pad(x_btc, ((0, 0), (pad, pad + extra), (0, 0)))
    if S == 1:
        x_ph = x_pad[None]
    else:
        x_ph = jnp.stack([x_pad[:, p::S, :] for p in range(S)], axis=0)
    x_ph = x_ph.reshape(S * B, T_ph, C_in)

    res2 = residual.reshape(B * T_out, C_out) if residual is not None else None
    kernel = functools.partial(_conv1d_kernel, K=K, stride=S, B=B, T_out=T_out,
                               act=act, has_res=res2 is not None)
    args = [x_ph, w, b] + ([res2] if res2 is not None else [])
    # TODO(synk): for long sequences, tile T_out with a haloed BlockSpec and a 'parallel'
    # grid axis (engages both v7x TensorCores); demo shapes fit a single VMEM block.
    y = pl.pallas_call(
        kernel,
        out_shape=jax.ShapeDtypeStruct((B * T_out, C_out), x_btc.dtype),
    )(*args)
    return y.reshape(B, T_out, C_out)


def gru_forward(x_btc, wih, whh, bih, bhh, *, fuse_tanh, t_chunk=128):
    """Single-layer GRU (PyTorch gate order r,z,n; h0 = 0), T-chunked; the input
    projection is fused into the recurrence kernel.  Returns (B, T, C)."""
    B, T, C = x_btc.shape
    x_tb = jnp.transpose(x_btc, (1, 0, 2)).reshape(T * B, C)   # time-major rows

    # Fold the biases that sit outside the r*(...) term (b_hn stays inside).
    b_fold = jnp.concatenate(
        [bih[:, :C] + bhh[:, :C],               # b_ir + b_hr
         bih[:, C:2 * C] + bhh[:, C:2 * C],     # b_iz + b_hz
         bih[:, 2 * C:]],                        # b_in
        axis=1)
    bhn = bhh[:, 2 * C:]

    Tc = min(T, t_chunk)
    n_chunks = pl.cdiv(T, Tc)
    unroll = max(1, min(4, Tc))
    kernel = functools.partial(_gru_kernel, Tc=Tc, B=B, C=C,
                               fuse_tanh=fuse_tanh, unroll=unroll)

    # TODO(synk): bf16 operands (x/wih) would halve DMA bytes; kept f32 to preserve the
    # 1e-4 correctness tolerance of the reference check.
    y = pl.pallas_call(
        kernel,
        out_shape=jax.ShapeDtypeStruct((T * B, C), x_btc.dtype),
        grid=(n_chunks,),
        in_specs=[
            pl.BlockSpec((Tc * B, C), lambda i: (i, 0)),
            pl.BlockSpec((C, 3 * C), lambda i: (0, 0)),
            pl.BlockSpec((1, 3 * C), lambda i: (0, 0)),
            pl.BlockSpec((C, 3 * C), lambda i: (0, 0)),
            pl.BlockSpec((1, C), lambda i: (0, 0)),
        ],
        out_specs=pl.BlockSpec((Tc * B, C), lambda i: (i, 0)),
        scratch_shapes=[pltpu.VMEM((B, C), jnp.float32),
                        pltpu.VMEM((Tc * B, 3 * C), jnp.float32)],
        compiler_params=pltpu.CompilerParams(
            dimension_semantics=("arbitrary",)),
    )(x_tb, wih, b_fold, whh, bhn)
    return jnp.transpose(y.reshape(T, B, C), (1, 0, 2))


# -----------------------------------------------------------------------------
# EncoderAudio forward
# -----------------------------------------------------------------------------
def encoder_audio_forward(x_nct, params, *, add_gru=True):
    # layout: input/output are NCT (B, C, T) like PyTorch Conv1d; kernels use (rows, C).
    x = jnp.transpose(x_nct, (0, 2, 1))  # (B, T, C_in)

    # EncoderBlocks: strided conv + SiLU (norm='none', attn=0, p_drop=0 -> identities).
    for blk in params["blocks"]:
        x = conv1d_block(x, blk["w"], blk["b"],
                         stride=blk["stride"], pad=blk["pad"], act="silu")

    # ResConvBlock: x + conv(silu(conv(x))).  Fuse the final tanh here when there is no GRU.
    fb = params["final"]
    h = conv1d_block(x, fb["w1"], fb["b1"], stride=1, pad=1, act="silu")
    final_act = None if add_gru else "tanh"
    x = conv1d_block(h, fb["w2"], fb["b2"], stride=1, pad=1, act=final_act, residual=x)

    if add_gru:
        g = params["gru"]
        x = gru_forward(x, g["wih"], g["whh"], g["bih"], g["bhh"],
                        fuse_tanh=True)       # final tanh fused into the GRU store

    return jnp.transpose(x, (0, 2, 1))        # back to (B, C, T)


# -----------------------------------------------------------------------------
# Pure-JAX reference (for correctness check)
# -----------------------------------------------------------------------------
def reference_forward(x_nct, params, *, add_gru=True):
    def conv(x, w, b, stride, pad, act, residual=None):
        wl = jnp.transpose(w, (2, 1, 0))  # (C_out, C_in, K)
        y = jax.lax.conv_general_dilated(
            x, wl, window_strides=(stride,), padding=[(pad, pad)],
            dimension_numbers=("NCH", "OIH", "NCH"))
        y = y + b.reshape(1, -1, 1)
        if residual is not None:
            y = y + residual
        if act:
            y = y * jax.nn.sigmoid(y)
        return y

    x = x_nct
    for blk in params["blocks"]:
        x = conv(x, blk["w"], blk["b"], blk["stride"], blk["pad"], True)
    fb = params["final"]
    h = conv(x, fb["w1"], fb["b1"], 1, 1, True)
    x = conv(h, fb["w2"], fb["b2"], 1, 1, False, residual=x)

    if add_gru:
        g = params["gru"]
        B, C, T = x.shape
        xt = jnp.transpose(x, (2, 0, 1))  # (T, B, C)

        def cell(hc, x_t):
            gi = x_t @ g["wih"] + g["bih"]
            gh = hc @ g["whh"] + g["bhh"]
            r = jax.nn.sigmoid(gi[:, :C] + gh[:, :C])
            z = jax.nn.sigmoid(gi[:, C:2 * C] + gh[:, C:2 * C])
            n = jnp.tanh(gi[:, 2 * C:] + r * gh[:, 2 * C:])
            hn = (1.0 - z) * n + z * hc
            return hn, hn

        _, ys = jax.lax.scan(cell, jnp.zeros((B, C), jnp.float32), xt)
        x = jnp.transpose(ys, (1, 2, 0))  # (B, C, T)
    return jnp.tanh(x)


# -----------------------------------------------------------------------------
# Deterministic parameter init
# -----------------------------------------------------------------------------
def init_params(key, in_dim, channels, kernel, strides, add_gru=True):
    chans = [in_dim] + list(channels)
    params = {"blocks": []}
    for i, (c_in, c_out, s, k) in enumerate(zip(chans[:-1], chans[1:], strides, kernel)):
        key, k1, k2 = jax.random.split(key, 3)
        scale = 1.0 / jnp.sqrt(c_in * k)
        params["blocks"].append({
            "w": (jax.random.normal(k1, (k, c_in, c_out), jnp.float32) * scale),
            "b": (jax.random.normal(k2, (1, c_out), jnp.float32) * 0.01),
            "stride": s, "pad": k // 2,
        })
    c = chans[-1]
    key, k1, k2, k3, k4 = jax.random.split(key, 5)
    scale = 1.0 / jnp.sqrt(c * 3)
    params["final"] = {
        "w1": jax.random.normal(k1, (3, c, c), jnp.float32) * scale,
        "b1": jax.random.normal(k2, (1, c), jnp.float32) * 0.01,
        "w2": jax.random.normal(k3, (3, c, c), jnp.float32) * scale,
        "b2": jax.random.normal(k4, (1, c), jnp.float32) * 0.01,
    }
    if add_gru:
        key, k1, k2, k3, k4 = jax.random.split(key, 5)
        gscale = 1.0 / jnp.sqrt(c)
        params["gru"] = {
            "wih": jax.random.normal(k1, (c, 3 * c), jnp.float32) * gscale,
            "whh": jax.random.normal(k2, (c, 3 * c), jnp.float32) * gscale,
            "bih": jax.random.normal(k3, (1, 3 * c), jnp.float32) * 0.01,
            "bhh": jax.random.normal(k4, (1, 3 * c), jnp.float32) * 0.01,
        }
    return params


# -----------------------------------------------------------------------------
# Demo
# -----------------------------------------------------------------------------
if __name__ == "__main__":
    # Config (gin-style): in_dim=4, channels=[8,16,32], kernel=3, strides=[2,2,1],
    # attn=0, activation='silu', norm='none', final_fn='tanh', add_gru=True, bias=True, p_drop=0.0
    in_dim = 4
    channels = [8, 16, 32]
    kernel = [3, 3, 3]
    strides = [2, 2, 1]
    add_gru = True

    B, T = 2, 16
    key = jax.random.PRNGKey(0)
    key, kx, kp = jax.random.split(key, 3)

    x = jax.random.normal(kx, (B, in_dim, T), jnp.float32)  # NCT, like PyTorch
    params = init_params(kp, in_dim, channels, kernel, strides, add_gru=add_gru)

    out = encoder_audio_forward(x, params, add_gru=add_gru)
    out = jax.block_until_ready(out)

    ref = jax.block_until_ready(reference_forward(x, params, add_gru=add_gru))

    assert out.shape == (B, channels[-1], 4), out.shape  # (B, C_out, T_out)
    assert jnp.allclose(out, ref, atol=1e-4, rtol=1e-4), float(jnp.max(jnp.abs(out - ref)))

    print("KERNEL_OK")
</pallas_src>

<mosaic_0001>
module attributes {stable_mosaic.version = 11 : i64} {
  func.func @_conv1d_kernel(%arg0: memref<4x9x4xf32, #tpu.memory_space<vmem>>, %arg1: memref<3x4x8xf32, #tpu.memory_space<vmem>>, %arg2: memref<1x8xf32, #tpu.memory_space<vmem>>, %arg3: memref<16x8xf32, #tpu.memory_space<vmem>>) attributes {dimension_semantics = [], scalar_prefetch = 0 : i64, scratch_operands = 0 : i64, tpu.core_type = #tpu.core_type<tc>} {
    %c0 = arith.constant 0 : index
    %c0_0 = arith.constant 0 : index
    %0 = vector.load %arg2[%c0, %c0_0] : memref<1x8xf32, #tpu.memory_space<vmem>>, vector<1x8xf32>
    %cst = arith.constant 0.000000e+00 : f32
    %1 = vector.broadcast %cst : f32 to vector<8x8xf32>
    %2 = vector.broadcast %0 : vector<1x8xf32> to vector<8x8xf32>
    %3 = arith.addf %1, %2 : vector<8x8xf32>
    %c0_1 = arith.constant 0 : index
    %c0_2 = arith.constant 0 : index
    %c0_3 = arith.constant 0 : index
    %4 = vector.load %arg0[%c0_1, %c0_2, %c0_3] : memref<4x9x4xf32, #tpu.memory_space<vmem>>, vector<1x8x4xf32>
    %5 = vector.shape_cast %4 : vector<1x8x4xf32> to vector<8x4xf32>
    %c0_4 = arith.constant 0 : index
    %c0_5 = arith.constant 0 : index
    %c0_6 = arith.constant 0 : index
    %6 = vector.load %arg1[%c0_4, %c0_5, %c0_6] : memref<3x4x8xf32, #tpu.memory_space<vmem>>, vector<1x4x8xf32>
    %7 = vector.shape_cast %6 : vector<1x4x8xf32> to vector<4x8xf32>
    %cst_7 = arith.constant dense<0.000000e+00> : vector<8x8xf32>
    %8 = tpu.matmul %5, %7, %cst_7 {dimension_numbers = #tpu.dot_dimension_numbers<[1], [0], [0], [1], [0, 0, 1, 1], [], []>} : vector<8x4xf32>, vector<4x8xf32>, vector<8x8xf32> -> vector<8x8xf32>
    %9 = arith.addf %3, %8 : vector<8x8xf32>
    %c2 = arith.constant 2 : index
    %c0_8 = arith.constant 0 : index
    %c0_9 = arith.constant 0 : index
    %10 = vector.load %arg0[%c2, %c0_8, %c0_9] : memref<4x9x4xf32, #tpu.memory_space<vmem>>, vector<1x8x4xf32>
    %11 = vector.shape_cast %10 : vector<1x8x4xf32> to vector<8x4xf32>
    %c1 = arith.constant 1 : index
    %c0_10 = arith.constant 0 : index
    %c0_11 = arith.constant 0 : index
    %12 = vector.load %arg1[%c1, %c0_10, %c0_11] : memref<3x4x8xf32, #tpu.memory_space<vmem>>, vector<1x4x8xf32>
    %13 = vector.shape_cast %12 : vector<1x4x8xf32> to vector<4x8xf32>
    %cst_12 = arith.constant dense<0.000000e+00> : vector<8x8xf32>
    %14 = tpu.matmul %11, %13, %cst_12 {dimension_numbers = #tpu.dot_dimension_numbers<[1], [0], [0], [1], [0, 0, 1, 1], [], []>} : vector<8x4xf32>, vector<4x8xf32>, vector<8x8xf32> -> vector<8x8xf32>
    %15 = arith.addf %9, %14 : vector<8x8xf32>
    %c0_13 = arith.constant 0 : index
    %c1_14 = arith.constant 1 : index
    %c0_15 = arith.constant 0 : index
    %16 = vector.load %arg0[%c0_13, %c1_14, %c0_15] : memref<4x9x4xf32, #tpu.memory_space<vmem>>, vector<1x8x4xf32>
    %17 = vector.shape_cast %16 : vector<1x8x4xf32> to vector<8x4xf32>
    %c2_16 = arith.constant 2 : index
    %c0_17 = arith.constant 0 : index
    %c0_18 = arith.constant 0 : index
    %18 = vector.load %arg1[%c2_16, %c0_17, %c0_18] : memref<3x4x8xf32, #tpu.memory_space<vmem>>, vector<1x4x8xf32>
    %19 = vector.shape_cast %18 : vector<1x4x8xf32> to vector<4x8xf32>
    %cst_19 = arith.constant dense<0.000000e+00> : vector<8x8xf32>
    %20 = tpu.matmul %17, %19, %cst_19 {dimension_numbers = #tpu.dot_dimension_numbers<[1], [0], [0], [1], [0, 0, 1, 1], [], []>} : vector<8x4xf32>, vector<4x8xf32>, vector<8x8xf32> -> vector<8x8xf32>
    %21 = arith.addf %15, %20 : vector<8x8xf32>
    %22 = arith.negf %21 : vector<8x8xf32>
    %23 = math.exp %22 : vector<8x8xf32>
    %cst_20 = arith.constant 1.000000e+00 : f32
    %24 = vector.broadcast %cst_20 : f32 to vector<8x8xf32>
    %25 = arith.addf %24, %23 : vector<8x8xf32>
    %26 = arith.divf %24, %25 : vector<8x8xf32>
    %27 = arith.mulf %21, %26 : vector<8x8xf32>
    %c0_21 = arith.constant 0 : index
    %c0_22 = arith.constant 0 : index
    %28 = vector.load %arg3[%c0_21, %c0_22] : memref<16x8xf32, #tpu.memory_space<vmem>>, vector<8x8xf32>
    tpu.vector_store %arg3[%c0_21, %c0_22], %27 {strides = array<i32>} : memref<16x8xf32, #tpu.memory_space<vmem>>, vector<8x8xf32>,
    %cst_23 = arith.constant 0.000000e+00 : f32
    %29 = vector.broadcast %cst_23 : f32 to vector<8x8xf32>
    %30 = vector.broadcast %0 : vector<1x8xf32> to vector<8x8xf32>
    %31 = arith.addf %29, %30 : vector<8x8xf32>
    %c1_24 = arith.constant 1 : index
    %c0_25 = arith.constant 0 : index
    %c0_26 = arith.constant 0 : index
    %32 = vector.load %arg0[%c1_24, %c0_25, %c0_26] : memref<4x9x4xf32, #tpu.memory_space<vmem>>, vector<1x8x4xf32>
    %33 = vector.shape_cast %32 : vector<1x8x4xf32> to vector<8x4xf32>
    %c0_27 = arith.constant 0 : index
    %c0_28 = arith.constant 0 : index
    %c0_29 = arith.constant 0 : index
    %34 = vector.load %arg1[%c0_27, %c0_28, %c0_29] : memref<3x4x8xf32, #tpu.memory_space<vmem>>, vector<1x4x8xf32>
    %35 = vector.shape_cast %34 : vector<1x4x8xf32> to vector<4x8xf32>
    %cst_30 = arith.constant dense<0.000000e+00> : vector<8x8xf32>
    %36 = tpu.matmul %33, %35, %cst_30 {dimension_numbers = #tpu.dot_dimension_numbers<[1], [0], [0], [1], [0, 0, 1, 1], [], []>} : vector<8x4xf32>, vector<4x8xf32>, vector<8x8xf32> -> vector<8x8xf32>
    %37 = arith.addf %31, %36 : vector<8x8xf32>
    %c3 = arith.constant 3 : index
    %c0_31 = arith.constant 0 : index
    %c0_32 = arith.constant 0 : index
    %38 = vector.load %arg0[%c3, %c0_31, %c0_32] : memref<4x9x4xf32, #tpu.memory_space<vmem>>, vector<1x8x4xf32>
    %39 = vector.shape_cast %38 : vector<1x8x4xf32> to vector<8x4xf32>
    %c1_33 = arith.constant 1 : index
    %c0_34 = arith.constant 0 : index
    %c0_35 = arith.constant 0 : index
    %40 = vector.load %arg1[%c1_33, %c0_34, %c0_35] : memref<3x4x8xf32, #tpu.memory_space<vmem>>, vector<1x4x8xf32>
    %41 = vector.shape_cast %40 : vector<1x4x8xf32> to vector<4x8xf32>
    %cst_36 = arith.constant dense<0.000000e+00> : vector<8x8xf32>
    %42 = tpu.matmul %39, %41, %cst_36 {dimension_numbers = #tpu.dot_dimension_numbers<[1], [0], [0], [1], [0, 0, 1, 1], [], []>} : vector<8x4xf32>, vector<4x8xf32>, vector<8x8xf32> -> vector<8x8xf32>
    %43 = arith.addf %37, %42 : vector<8x8xf32>
    %c1_37 = arith.constant 1 : index
    %c1_38 = arith.constant 1 : index
    %c0_39 = arith.constant 0 : index
    %44 = vector.load %arg0[%c1_37, %c1_38, %c0_39] : memref<4x9x4xf32, #tpu.memory_space<vmem>>, vector<1x8x4xf32>
    %45 = vector.shape_cast %44 : vector<1x8x4xf32> to vector<8x4xf32>
    %c2_40 = arith.constant 2 : index
    %c0_41 = arith.constant 0 : index
    %c0_42 = arith.constant 0 : index
    %46 = vector.load %arg1[%c2_40, %c0_41, %c0_42] : memref<3x4x8xf32, #tpu.memory_space<vmem>>, vector<1x4x8xf32>
    %47 = vector.shape_cast %46 : vector<1x4x8xf32> to vector<4x8xf32>
    %cst_43 = arith.constant dense<0.000000e+00> : vector<8x8xf32>
    %48 = tpu.matmul %45, %47, %cst_43 {dimension_numbers = #tpu.dot_dimension_numbers<[1], [0], [0], [1], [0, 0, 1, 1], [], []>} : vector<8x4xf32>, vector<4x8xf32>, vector<8x8xf32> -> vector<8x8xf32>
    %49 = arith.addf %43, %48 : vector<8x8xf32>
    %50 = arith.negf %49 : vector<8x8xf32>
    %51 = math.exp %50 : vector<8x8xf32>
    %cst_44 = arith.constant 1.000000e+00 : f32
    %52 = vector.broadcast %cst_44 : f32 to vector<8x8xf32>
    %53 = arith.addf %52, %51 : vector<8x8xf32>
    %54 = arith.divf %52, %53 : vector<8x8xf32>
    %55 = arith.mulf %49, %54 : vector<8x8xf32>
    %c8 = arith.constant 8 : index
    %c0_45 = arith.constant 0 : index
    %56 = vector.load %arg3[%c8, %c0_45] : memref<16x8xf32, #tpu.memory_space<vmem>>, vector<8x8xf32>
    tpu.vector_store %arg3[%c8, %c0_45], %55 {strides = array<i32>} : memref<16x8xf32, #tpu.memory_space<vmem>>, vector<8x8xf32>,
    return
  }
}

</mosaic_0001>

<bundles_post_ra>
// kernel: tpu_custom_call.1
= control target key start
LH: loop header
LB: loop body
LE: loop exit
PB: predicated region body
PF: predicated region fallthrough
CT: control target
= control target key end

     0   :  { %vm28_vm0 = vcmask 1043456   ;;  %vm24_vm1 = vcmask 31744   ;;  %v599_v0 = vmov 0.0   ;;  %vm600_vm2 = vmmov 0   ;;  %s684_s1 = inlined_call_operand.vmem [shape: f32[3,4,8], index: 1, kind: input, shape index: {}]   ;;  %s685_s0 = inlined_call_operand.vmem [shape: f32[4,9,4], index: 0, kind: input, shape index: {}]   ;;  %s686_s2 = inlined_call_operand.vmem [shape: f32[1,8], index: 2, kind: input, shape index: {}]   ;;  %s687_s3 = inlined_call_operand.vmem [shape: f32[16,8], index: 3, kind: output, shape index: {}]  }
   0x1   :  { %559 = vmatprep.subr.mxu0 %v599_v0  ;;  %v23_v1 = vld [vmem:[%s684_s1] sm:$0xf]  ;;  %561 = vmatprep.mubr.msk.f32.mxu0 %vm600_vm2, %v599_v0  ;;  %v528_v3 = vld [vmem:[%s684_s1 + $0x4] sm:$0xf]  ;;  %v531_v5 = vld [vmem:[%s684_s1 + $0x8] sm:$0xf] }
   0x2   :  { %v22_v2 = vld [vmem:[%s685_s0] sm:$0xff]  ;;  %560 = vmatpush3.msk.msra.mxu0 %vm28_vm0, %v23_v1  ;;  %564 = vmatprep.subr.mxu1 %v599_v0  ;;  %v535_v8 = vld [vmem:[%s685_s0 + $0x10] sm:$0xff]  ;;  %v543_v10 = vld [vmem:[%s684_s1 + $0x8] sm:$0xf]  ;;  %vm271_vm3 = vcmask 64512  }
   0x3   :  { %v527_v4 = vld [vmem:[%s685_s0 + $0x20] sm:$0xff]  ;;  %562 = vmatmul.mubr.msk.f32.vlgmr.msra.gmra.mxu0 %vm24_vm1, %v22_v2  ;;  %565 = vmatpush3.msk.msra.mxu1 %vm28_vm0, %v528_v3  ;;  %v538_v11 = vld [vmem:[%s685_s0 + $0x30] sm:$0xff] }
   0x4   :  { %566 = vmatprep.mubr.msk.f32.mxu1 %vm600_vm2, %v599_v0  ;;  %569 = vmatprep.subr.mxu0 %v599_v0  ;;  %v275_v6 = vld [vmem:[%s684_s1] sm:$0xf]  ;;  %v539_v9 = vld [vmem:[%s684_s1 + $0x4] sm:$0xf]  ;;  %v542_v12 = vld [vmem:[%s685_s0 + $0x11] sm:$0xff] }
   0x5   :  { %v184_v7 = vld [vmem:[%s685_s0 + $0x1] sm:$0xff]  ;;  %567 = vmatmul.mubr.msk.f32.vlgmr.msra.gmra.mxu1 %vm24_vm1, %v527_v4  ;;  %570 = vmatpush3.msk.msra.mxu0 %vm28_vm0, %v531_v5  ;;  %v524_v13 = vld [vmem:[%s686_s2] ss:$0 sm:$0xff] }
   0x6   :  { %574 = vmatprep.subr.mxu1 %v599_v0  ;;  %571 = vmatprep.mubr.msk.f32.mxu0 %vm600_vm2, %v599_v0 }
   0x7   :  { %575 = vmatpush3.msk.msra.mxu1 %vm28_vm0, %v275_v6  ;;  %572 = vmatmul.mubr.msk.f32.vlgmr.msra.gmra.mxu0 %vm24_vm1, %v184_v7 }
   0x8   :  { %576 = vmatprep.mubr.msk.f32.mxu1 %vm600_vm2, %v599_v0  ;;  %579 = vmatprep.subr.mxu0 %v599_v0 }
   0x9   :  { %577 = vmatmul.mubr.msk.f32.vlgmr.msra.gmra.mxu1 %vm24_vm1, %v535_v8  ;;  %580 = vmatpush3.msk.msra.mxu0 %vm28_vm0, %v539_v9 }
   0xa   :  { %584 = vmatprep.subr.mxu1 %v599_v0  ;;  %581 = vmatprep.mubr.msk.f32.mxu0 %vm600_vm2, %v599_v0 }
   0xb   :  { %585 = vmatpush3.msk.msra.mxu1 %vm28_vm0, %v543_v10  ;;  %582 = vmatmul.mubr.msk.f32.vlgmr.msra.gmra.mxu0 %vm24_vm1, %v538_v11 }
   0xc   :  { %586 = vmatprep.mubr.msk.f32.mxu1 %vm600_vm2, %v599_v0 }
   0xd   :  { %587 = vmatmul.mubr.msk.f32.vlgmr.msra.gmra.mxu1 %vm24_vm1, %v542_v12 }
  0xc3   :  { %v98_v14 = vpop.f32.mrf.mxu0 }
  0xc4   :  { %v102_v15 = vadd.f32 %v524_v13, %v98_v14 }
  0xc5   :  { %v179_v16 = vpop.f32.mrf.mxu1  ;;  %v563_v17 = vpop.f32.mrf.mxu0 }
  0xc6   :  { %v183_v18 = vadd.f32 %v179_v16, %v102_v15 }
  0xc7   :  { %v568_v19 = vpop.f32.mrf.mxu1  ;;  %v259_v20 = vpop.f32.mrf.mxu0 }
  0xc8   :  { %v263_v21 = vadd.f32 %v259_v20, %v183_v18 }
  0xc9   :  { %v348_v22 = vpop.f32.mrf.mxu1  ;;  %v573_v23 = vpop.f32.mrf.mxu0 }
  0xca   :  { %v534_v24 = vmul.f32 -1.442695, %v263_v21  ;;  %v352_v25 = vadd.f32 %v524_v13, %v348_v22 }
  0xcb   :  { %v578_v26 = vpop.f32.mrf.mxu1  ;;  %v428_v27 = vpop.f32.mrf.mxu0 }
  0xcc   :  { %591 = vpow2.f32 %v534_v24  ;;  %v432_v28 = vadd.f32 %v428_v27, %v352_v25 }
  0xcd   :  { %v507_v29 = vpop.f32.mrf.mxu1  ;;  %v583_v30 = vpop.f32.mrf.mxu0 }
  0xce   :  { %v511_v31 = vadd.f32 %v507_v29, %v432_v28 }
  0xcf   :  { %v588_v32 = vpop.f32.mrf.mxu1 }
  0xd0   :  { %v546_v33 = vmul.f32 -1.442695, %v511_v31 }
  0xd2   :  { %593 = vpow2.f32 %v546_v33 }
  0xd9   :  { %v592_v34 = vpop.eup %591 }
  0xda   :  { %v267_v35 = vadd.f32 1.0, %v592_v34 }
  0xdc   :  { %595 = vrcp.f32 %v267_v35 }
  0xdf   :  { %v594_v36 = vpop.eup %593 }
  0xe0   :  { %v515_v37 = vadd.f32 1.0, %v594_v36 }
  0xe2   :  { %597 = vrcp.f32 %v515_v37 }
  0xe9   :  { %v596_v38 = vpop.eup %595 }
  0xea   :  { %v270_v39 = vmul.f32 %v596_v38, %v263_v21 }
  0xec   :  { %272 = vst.msk [vmem:[%s687_s3] sm:$0xff] %vm271_vm3, %v270_v39 }
  0xef   :  { %v598_v40 = vpop.eup %597 }
  0xf0   :  { %v518_v41 = vmul.f32 %v598_v40, %v511_v31 }
  0xf2   :  { %519 = vst.msk [vmem:[%s687_s3 + $0x8] sm:$0xff] %vm271_vm3, %v518_v41 }

</bundles_post_ra>
